<compile_context>
chip_gen: v6e
topology: v6e:2x2x1
jax: 0.10.0
libtpu: 0.0.40
codegen_flags: <defaults>
</compile_context>

<pallas_src>
import functools

import numpy as np
import jax
import jax.numpy as jnp
from jax.experimental import pallas as pl
from jax.experimental.pallas import tpu as pltpu

_MIB = 1024 * 1024

# Per-generation tile limits: (tm_max, tn_max, tk_max, vmem_cap_bytes).
_TILE_TABLE = {
    "v5e": (512, 512, 1024, 100 * _MIB),      # 128 MiB physical VMEM
    "v6e": (1024, 2048, 1024, 100 * _MIB),    # needs ~650 FLOP/byte AI
    "v7x": (512, 1024, 1024, 48 * _MIB),      # only 64 MiB physical VMEM/TC
    "unknown": (512, 1024, 512, 48 * _MIB),
}


def _round_up(v: int, m: int) -> int:
    return ((v + m - 1) // m) * m


def _tpu_generation() -> str:
    try:
        kind = jax.devices()[0].device_kind.lower()
    except Exception:
        return "unknown"
    if "v7" in kind:
        return "v7x"
    if "v6" in kind:
        return "v6e"
    if "v5" in kind or "v4" in kind:
        return "v5e"
    return "unknown"


def _pick_tile(dim: int, max_tile: int, align: int,
               max_waste_frac: float = 0.0625) -> int:
    """Largest tile (multiple of `align`, <= max_tile) with small padding waste."""
    if dim <= max_tile:
        return dim
    cands = list(range(align, max_tile + 1, align))
    ok = [t for t in cands if ((-dim) % t) / dim <= max_waste_frac]
    if ok:
        return max(ok)
    # No low-waste candidate: minimize absolute waste, ties -> largest tile.
    return min(cands, key=lambda t: ((-dim) % t, -t))


def _vmem_limit_bytes(tm, tn, tk, out_bytes, wbuf, cap):
    est = (tm * tk * 2 * 2            # x    (bf16, double buffered)
           + tk * tn * 2 * wbuf       # W    (bf16, wbuf-deep)
           + tn * 4 * 2               # bias (f32)
           + tm * tn * out_bytes * 2  # output tile (double buffered)
           + tm * tn * 4)             # f32 accumulator scratch
    return int(min(cap, max(32 * _MIB, int(est * 1.3))))


def _linear_kernel(x_ref, w_ref, b_ref, o_ref, acc_ref):
    """One (tm, tn) output tile; k (reduction) is the innermost grid axis."""
    k = pl.program_id(2)

    @pl.when(k == 0)
    def _():
        # Fold the bias into the accumulator init: epilogue is cast+store only.
        acc_ref[...] = jnp.broadcast_to(b_ref[...], acc_ref.shape)

    acc_ref[...] += jnp.dot(x_ref[...], w_ref[...],
                            preferred_element_type=jnp.float32)

    @pl.when(k == pl.num_programs(2) - 1)
    def _():
        o_ref[...] = acc_ref[...].astype(o_ref.dtype)


@functools.partial(
    jax.jit,
    static_argnames=("n_valid", "tm_max", "tn", "tk", "out_dtype", "vmem_cap"))
def _linear_fwd(x, w_pad, b_pad, *, n_valid, tm_max, tn, tk, out_dtype,
                vmem_cap):
    """y[..., :n_valid] = x @ w_pad[:K, :n_valid] + b_pad[0, :n_valid]."""
    orig_shape = x.shape
    K = orig_shape[-1]
    Kpad, Npad = w_pad.shape

    x2d = x.reshape(-1, K).astype(jnp.bfloat16)
    M = x2d.shape[0]

    # ---- M tiling (per call; N/K tiling + weight padding fixed at init) ----
    Mp = _round_up(M, 16)                 # bf16 sublane multiple
    tm = _pick_tile(Mp, tm_max, 16)
    Mpad = _round_up(Mp, tm)

    # Cast + pad of x fuse into a single XLA pass under this jit.
    x2d = jnp.pad(x2d, ((0, Mpad - M), (0, Kpad - K)))

    grid = (Mpad // tm, Npad // tn, Kpad // tk)

    # Decode shapes (small M) are weight-streaming bound: a 3-deep weight
    # buffer keeps the HBM stream full when there are enough tiles to rotate.
    weight_steps = grid[1] * grid[2]
    wbuf = 2
    w_spec = pl.BlockSpec((tk, tn), lambda i, j, k: (k, j))
    if Mpad <= 64 and weight_steps >= 3 and hasattr(pl, "Buffered"):
        try:
            w_spec = pl.BlockSpec((tk, tn), lambda i, j, k: (k, j),
                                  pipeline_mode=pl.Buffered(3))
            wbuf = 3
        except TypeError:
            pass  # older BlockSpec signature: fall back to double buffering

    out_bytes = np.dtype(out_dtype).itemsize
    vmem_limit = _vmem_limit_bytes(tm, tn, tk, out_bytes, wbuf, vmem_cap)

    out = pl.pallas_call(
        _linear_kernel,
        out_shape=jax.ShapeDtypeStruct((Mpad, Npad), out_dtype),
        grid_spec=pltpu.PrefetchScalarGridSpec(
            num_scalar_prefetch=0,
            grid=grid,
            in_specs=[
                pl.BlockSpec((tm, tk), lambda i, j, k: (i, k)),   # activations
                w_spec,                                            # weight (K,N)
                pl.BlockSpec((1, tn), lambda i, j, k: (0, j)),     # bias
            ],
            out_specs=pl.BlockSpec((tm, tn), lambda i, j, k: (i, j)),
            scratch_shapes=[pltpu.VMEM((tm, tn), jnp.float32)],
        ),
        compiler_params=pltpu.CompilerParams(
            dimension_semantics=("parallel", "parallel", "arbitrary"),
            vmem_limit_bytes=vmem_limit),
    )(x2d, w_pad, b_pad)

    out = out[:M, :n_valid]
    return out.reshape(*orig_shape[:-1], n_valid)


class LinearBasePallas:
    """Mirror of LinearBase with tp_size=1 / tp_rank=0 (no torch.distributed)."""

    def __init__(self, input_size: int, output_size: int,
                 tp_dim: int | None = None, out_dtype=None):
        self.input_size = input_size
        self.output_size = output_size
        self.tp_dim = tp_dim
        self.tp_rank = 0   # dist.get_rank()       -> single device
        self.tp_size = 1   # dist.get_world_size() -> single device
        # None -> follow x.dtype; pass jnp.bfloat16 to halve output writeback.
        self.out_dtype = out_dtype

        # Deterministic parameter init (synthetic; stand-in for checkpoint load).
        kw, kb = jax.random.split(jax.random.PRNGKey(0))
        scale = 1.0 / (input_size ** 0.5)
        self.weight = (jax.random.normal(kw, (output_size, input_size),
                                         dtype=jnp.float32) * scale)
        self.bias = (jax.random.normal(kb, (output_size,),
                                       dtype=jnp.float32) * scale)

        # ---- One-time per-generation tiling & weight prep ------------------
        gen = _tpu_generation()
        tm_max, tn_max, tk_max, vmem_cap = _TILE_TABLE.get(
            gen, _TILE_TABLE["unknown"])
        K, N = input_size, output_size
        Kp128 = _round_up(K, 128)
        Np128 = _round_up(N, 128)
        self._tk = _pick_tile(Kp128, tk_max, 128)
        self._tn = _pick_tile(Np128, tn_max, 128)
        self._tm_max = tm_max
        self._vmem_cap = vmem_cap
        Kpad = _round_up(Kp128, self._tk)
        Npad = _round_up(Np128, self._tn)

        # (K, N) layout, bf16, zero-padded to tile multiples -- materialized
        # ONCE so every forward streams the weight straight from HBM with zero
        # per-call transpose / pad traffic.
        w_kn = jnp.asarray(self.weight.T, dtype=jnp.bfloat16)
        self.weight_kn = jnp.pad(w_kn, ((0, Kpad - K), (0, Npad - N)))
        self.bias_pad = jnp.pad(self.bias.reshape(1, N).astype(jnp.float32),
                                ((0, 0), (0, Npad - N)))

    def __call__(self, x):
        out_dtype = self.out_dtype if self.out_dtype is not None else x.dtype
        out_dtype = jax.dtypes.canonicalize_dtype(out_dtype)
        return _linear_fwd(
            x, self.weight_kn, self.bias_pad,
            n_valid=self.output_size,
            tm_max=self._tm_max, tn=self._tn, tk=self._tk,
            out_dtype=out_dtype, vmem_cap=self._vmem_cap)


if __name__ == "__main__":
    batch, seq, input_size, output_size = 2, 8, 32, 64

    layer = LinearBasePallas(input_size, output_size, tp_dim=None)

    x = jax.random.normal(jax.random.PRNGKey(1), (batch, seq, input_size),
                          dtype=jnp.float32)

    y = layer(x)
    y = jax.block_until_ready(y)

    # Reference with matching bf16-operand / f32-accumulate numerics.
    x_bf = x.reshape(-1, input_size).astype(jnp.bfloat16)
    w_kn_bf = layer.weight.astype(jnp.bfloat16).T          # (K, N), unpadded
    y_ref = (jnp.dot(x_bf, w_kn_bf, preferred_element_type=jnp.float32)
             + layer.bias[None, :]).reshape(batch, seq, output_size)

    # Loose check against the full-precision f32 linear as well.
    y_f32 = x @ layer.weight.T + layer.bias

    assert y.shape == (batch, seq, output_size)
    assert jnp.allclose(y, y_ref, atol=1e-3, rtol=1e-3)
    assert jnp.allclose(y, y_f32, atol=5e-2, rtol=5e-2)

    print("KERNEL_OK")
</pallas_src>

<mosaic_0001>
module attributes {stable_mosaic.version = 11 : i64} {
  func.func @_linear_kernel(%arg0: i32, %arg1: i32, %arg2: i32, %arg3: memref<16x128xbf16, #tpu.memory_space<vmem>>, %arg4: memref<128x128xbf16, #tpu.memory_space<vmem>>, %arg5: memref<1x128xf32, #tpu.memory_space<vmem>>, %arg6: memref<16x128xf32, #tpu.memory_space<vmem>>, %arg7: memref<16x128xf32, #tpu.memory_space<vmem>>) attributes {dimension_semantics = [#tpu.dimension_semantics<parallel>, #tpu.dimension_semantics<parallel>, #tpu.dimension_semantics<arbitrary>], iteration_bounds = array<i64: 1, 1, 1>, scalar_prefetch = 0 : i64, scratch_operands = 1 : i64, tpu.core_type = #tpu.core_type<tc>, window_params = [{transform_indices = @transform_0, window_bounds = array<i64: 16, 128>}, {transform_indices = @transform_1, window_bounds = array<i64: 128, 128>}, {transform_indices = @transform_2, window_bounds = array<i64: 1, 128>}, {transform_indices = @transform_3, window_bounds = array<i64: 16, 128>}]} {
    %c0_i32 = arith.constant 0 : i32
    %0 = arith.cmpi eq, %arg2, %c0_i32 : i32
    %1 = arith.extui %0 : i1 to i32
    %c0_i32_0 = arith.constant 0 : i32
    %2 = arith.cmpi ne, %1, %c0_i32_0 : i32
    scf.if %2 {
      %c0_10 = arith.constant 0 : index
      %c0_11 = arith.constant 0 : index
      %12 = vector.load %arg5[%c0_10, %c0_11] : memref<1x128xf32, #tpu.memory_space<vmem>>, vector<1x128xf32>
      %13 = vector.shape_cast %12 : vector<1x128xf32> to vector<1x128xf32>
      %14 = vector.broadcast %13 : vector<1x128xf32> to vector<16x128xf32>
      %c0_12 = arith.constant 0 : index
      %c0_13 = arith.constant 0 : index
      %15 = vector.load %arg7[%c0_12, %c0_13] : memref<16x128xf32, #tpu.memory_space<vmem>>, vector<16x128xf32>
      tpu.vector_store %arg7[%c0_12, %c0_13], %14 {strides = array<i32>} : memref<16x128xf32, #tpu.memory_space<vmem>>, vector<16x128xf32>,
    } else {
    }
    %c0 = arith.constant 0 : index
    %c0_1 = arith.constant 0 : index
    %3 = vector.load %arg7[%c0, %c0_1] : memref<16x128xf32, #tpu.memory_space<vmem>>, vector<16x128xf32>
    %c0_2 = arith.constant 0 : index
    %c0_3 = arith.constant 0 : index
    %4 = vector.load %arg3[%c0_2, %c0_3] : memref<16x128xbf16, #tpu.memory_space<vmem>>, vector<16x128xbf16>
    %c0_4 = arith.constant 0 : index
    %c0_5 = arith.constant 0 : index
    %5 = vector.load %arg4[%c0_4, %c0_5] : memref<128x128xbf16, #tpu.memory_space<vmem>>, vector<128x128xbf16>
    %cst = arith.constant dense<0.000000e+00> : vector<16x128xf32>
    %6 = tpu.matmul %4, %5, %cst {dimension_numbers = #tpu.dot_dimension_numbers<[1], [0], [0], [1], [0, 0, 1, 1], [], []>} : vector<16x128xbf16>, vector<128x128xbf16>, vector<16x128xf32> -> vector<16x128xf32>
    %7 = arith.addf %3, %6 : vector<16x128xf32>
    %c0_6 = arith.constant 0 : index
    %c0_7 = arith.constant 0 : index
    %8 = vector.load %arg7[%c0_6, %c0_7] : memref<16x128xf32, #tpu.memory_space<vmem>>, vector<16x128xf32>
    tpu.vector_store %arg7[%c0_6, %c0_7], %7 {strides = array<i32>} : memref<16x128xf32, #tpu.memory_space<vmem>>, vector<16x128xf32>,
    %c0_i32_8 = arith.constant 0 : i32
    %9 = arith.cmpi eq, %arg2, %c0_i32_8 : i32
    %10 = arith.extui %9 : i1 to i32
    %c0_i32_9 = arith.constant 0 : i32
    %11 = arith.cmpi ne, %10, %c0_i32_9 : i32
    scf.if %11 {
      %c0_10 = arith.constant 0 : index
      %c0_11 = arith.constant 0 : index
      %12 = vector.load %arg7[%c0_10, %c0_11] : memref<16x128xf32, #tpu.memory_space<vmem>>, vector<16x128xf32>
      %c0_12 = arith.constant 0 : index
      %c0_13 = arith.constant 0 : index
      %13 = vector.load %arg6[%c0_12, %c0_13] : memref<16x128xf32, #tpu.memory_space<vmem>>, vector<16x128xf32>
      tpu.vector_store %arg6[%c0_12, %c0_13], %12 {strides = array<i32>} : memref<16x128xf32, #tpu.memory_space<vmem>>, vector<16x128xf32>,
    } else {
    }
    return
  }
  func.func @transform_0(%arg0: i32, %arg1: i32, %arg2: i32) -> (i32, i32) {
    %c0_i32 = arith.constant 0 : i32
    return %arg0, %arg2 : i32, i32
  }
  func.func @transform_1(%arg0: i32, %arg1: i32, %arg2: i32) -> (i32, i32) {
    %c0_i32 = arith.constant 0 : i32
    return %arg2, %arg1 : i32, i32
  }
  func.func @transform_2(%arg0: i32, %arg1: i32, %arg2: i32) -> (i32, i32) {
    %c0_i32 = arith.constant 0 : i32
    %c0_i32_0 = arith.constant 0 : i32
    return %c0_i32, %arg1 : i32, i32
  }
  func.func @transform_3(%arg0: i32, %arg1: i32, %arg2: i32) -> (i32, i32) {
    %c0_i32 = arith.constant 0 : i32
    return %arg0, %arg1 : i32, i32
  }
}

</mosaic_0001>

<bundles_post_ra>
// kernel: _linear_fwd.1
= control target key start
LH: loop header
LB: loop body
LE: loop exit
PB: predicated region body
PF: predicated region fallthrough
CT: control target
= control target key end

     0   :  { %8 = vsyncpa [#allocation4], 0  ;;  %s248_s12 = smov [#allocation3]   ;;  %s288_s0 = inlined_call_operand.vmem [shape: bf16[16,128], index: 0, kind: input, shape index: {}]   ;;  %s289_s1 = inlined_call_operand.hbm [shape: bf16[128,128], index: 1, kind: input, shape index: {}]   ;;  %s290_s2 = inlined_call_operand.vmem [shape: f32[1,128], index: 2, kind: input, shape index: {}]   ;;  %s291_s3 = inlined_call_operand.vmem [shape: f32[16,128], index: 3, kind: output, shape index: {}]  }
   0x1   :  { %s16_s13 = sshll.u32 %s248_s12, 4  ;;  %s17_s13 = int_to_ptr.vmem [resolvable:$true] %s16_s13 }
   0x2   :  { %s234_s14 = scalar_lea.vmem %s17_s13, 1024  ;;  %p239_p1 = scmp.lt.s32.totalorder %s17_s13, %s17_s13 }
   0x3   :  { %p235_p0 = scmp.ne.s32.totalorder %s17_s13, %s234_s14  ;;  %p240_p2 = scmp.lt.s32.totalorder %s234_s14, %s234_s14 }
   0x5   :  { %p241_p3 = por %p240_p2, %p239_p1 }
   0x7   :  { %p242_p4 = pnand %p241_p3, %p235_p0 }
   0x9   :  { %245 = shalt.err (!%p242_p4)
}
   0xa   :  { %s249_s15 = smov 64   ;;  %s250_s16 = smov 4  }
   0xb   :  { %22 = dma.hbm_to_vmem [thread:$0]  %s289_s1, 1024, %s17_s13, [#allocation4], %s249_s15, %s249_s15, %s250_s16  }
   0xc   :  { %246 = dma.done.wait [#allocation4], 1024  }
   0xd   :  { %247 = vsyncadd [#allocation4], 4294966272  ;;  %v251_v0 = vmov 0.0   ;;  %vm252_vm0 = vmmov 0   ;;  %v217_v1 = vld [vmem:[#allocation3 + $0x38] sm:$0xff]   ;;  %v218_v2 = vld [vmem:[#allocation3 + $0x30] sm:$0xff]  }
   0xe   :  { %192 = vmatprep.subr.bf16.mxu0 %v251_v0  ;;  %208 = vmatprep.mubr.msk.bf16.mxu0 %vm252_vm0, %v251_v0  ;;  %v219_v3 = vld [vmem:[#allocation3 + $0x28] sm:$0xff]   ;;  %v220_v4 = vld [vmem:[#allocation3 + $0x20] sm:$0xff]   ;;  %v221_v5 = vld [vmem:[#allocation3 + $0x18] sm:$0xff]  }
   0xf   :  { %193 = vmatpush3.bf16.msra.mxu0 %v217_v1  ;;  %v222_v6 = vld [vmem:[#allocation3 + $0x10] sm:$0xff]   ;;  %v223_v7 = vld [vmem:[#allocation3 + $0x8] sm:$0xff]   ;;  %v224_v8 = vld [vmem:[#allocation3] sm:$0xff]  }
  0x10   :  { %194 = vmatprep.subr.bf16.mxu0 %v251_v0  ;;  %v225_v9 = vld [vmem:[%s288_s0] sm:$0xff]  }
  0x11   :  { %v173_v10 = vld [vmem:[%s290_s2] ss:$0 sm:$0xff] }
  0x13   :  { %195 = vmatpush3.bf16.msra.mxu0 %v218_v2 }
  0x14   :  { %196 = vmatprep.subr.bf16.mxu0 %v251_v0 }
  0x17   :  { %197 = vmatpush3.bf16.msra.mxu0 %v219_v3 }
  0x18   :  { %198 = vmatprep.subr.bf16.mxu0 %v251_v0 }
  0x1b   :  { %199 = vmatpush3.bf16.msra.mxu0 %v220_v4 }
  0x1c   :  { %200 = vmatprep.subr.bf16.mxu0 %v251_v0 }
  0x1f   :  { %201 = vmatpush3.bf16.msra.mxu0 %v221_v5 }
  0x20   :  { %202 = vmatprep.subr.bf16.mxu0 %v251_v0 }
  0x23   :  { %203 = vmatpush3.bf16.msra.mxu0 %v222_v6 }
  0x24   :  { %204 = vmatprep.subr.bf16.mxu0 %v251_v0 }
  0x27   :  { %205 = vmatpush3.bf16.msra.mxu0 %v223_v7 }
  0x28   :  { %206 = vmatprep.subr.bf16.mxu0 %v251_v0 }
  0x2b   :  { %207 = vmatpush3.bf16.msra.mxu0 %v224_v8 }
  0x2e   :  { %209 = vmatmul.mubr.bf16.vlgmr.msra.gmra.mxu0 %v225_v9 }
  0xee   :  { %v150_v11 = vpop.f32.mrf.mxu0 }
  0xef   :  { %v157_v12 = vadd.f32 %v173_v10, %v150_v11 }
  0xf0   :  { %v210_v13 = vpop.f32.mrf.mxu0 }
  0xf1   :  { %166 = vst [vmem:[%s291_s3] sm:$0xff] %v157_v12 }
  0xf2   :  { %v153_v14 = vpop.f32.mrf.mxu0 }
  0xf3   :  { %v158_v15 = vadd.f32 %v173_v10, %v153_v14 }
  0xf4   :  { %v211_v16 = vpop.f32.mrf.mxu0 }
  0xf5   :  { %167 = vst [vmem:[%s291_s3 + $0x8] sm:$0xff] %v158_v15 }
  0xf6   :  { %172 = vsyncpa [#allocation4], 1 }

</bundles_post_ra>
